<compile_context>
chip_gen: v7x
topology: tpu7x:2x2x1
jax: 0.10.0
libtpu: 0.0.40
codegen_flags: <defaults>
</compile_context>

<pallas_src>
import jax
import jax.numpy as jnp
from jax.experimental import pallas as pl
from jax.experimental.pallas import tpu as pltpu


def _mvn_logprob_kernel(x_ref, mu_ref, inv_std_ref, sel_ref, bias_ref, out_ref):
    # x_ref:       (TILE_R, L)    packed points, L = D * PACK lanes
    # mu_ref:      (1, L)         means tiled PACK times
    # inv_std_ref: (1, L)         1/sigma tiled PACK times
    # sel_ref:     (L, PACK)      -0.5 where lane l belongs to segment p, else 0
    # bias_ref:    (1, PACK)      -(sum(log_std) + 0.5*D*log(2*pi))
    # out_ref:     (TILE_R, PACK) out[r, p] = log_prob of original row r*PACK + p
    z = (x_ref[...] - mu_ref[...]) * inv_std_ref[...]     # VPU
    zz = z * z                                             # VPU
    out_ref[...] = (
        jnp.dot(zz, sel_ref[...], preferred_element_type=jnp.float32)  # MXU
        + bias_ref[...]
    )


def mvn_log_prob(x, means, log_stds, *, max_tile_rows=2048):
    """x: (N, D), means: (D,), log_stds: (D,)  ->  (N,) f32 log-probs."""
    n, d = x.shape
    x = x.astype(jnp.float32)
    means = means.astype(jnp.float32)
    log_stds = log_stds.astype(jnp.float32)

    # --- hoisted parameter preprocessing (O(D) wrapper work) -----------------
    inv_std = jnp.exp(-log_stds)                                    # (D,)
    bias = -(jnp.sum(log_stds) + 0.5 * d * jnp.log(2.0 * jnp.pi))   # scalar

    # --- lane packing: PACK original rows per 128-lane packed row ------------
    pack = (128 // d) if (d <= 128 and 128 % d == 0) else 1
    lanes = d * pack

    mu_t = jnp.tile(means, pack).reshape(1, lanes)
    inv_t = jnp.tile(inv_std, pack).reshape(1, lanes)
    seg = jnp.repeat(jnp.arange(pack, dtype=jnp.int32), d)           # (lanes,)
    sel = jnp.where(
        seg[:, None] == jnp.arange(pack, dtype=jnp.int32)[None, :],
        jnp.float32(-0.5), jnp.float32(0.0))                         # (lanes, pack)
    bias_row = jnp.full((1, pack), bias, dtype=jnp.float32)

    # --- batch tiling + explicit ragged-tail padding --------------------------
    rows = pl.cdiv(n, pack)                     # packed rows needed
    tile_r = min(max_tile_rows, rows)
    tile_r = ((tile_r + 7) // 8) * 8            # sublane (8) multiple
    grid_r = pl.cdiv(rows, tile_r)
    rows_pad = grid_r * tile_r
    n_pad = rows_pad * pack
    if n_pad != n:
        # zero rows -> finite garbage log-probs, sliced off below
        x = jnp.pad(x, ((0, n_pad - n), (0, 0)))
    xp = x.reshape(rows_pad, lanes)             # contiguous, free reshape

    out = pl.pallas_call(
        _mvn_logprob_kernel,
        out_shape=jax.ShapeDtypeStruct((rows_pad, pack), jnp.float32),
        grid_spec=pltpu.PrefetchScalarGridSpec(
            num_scalar_prefetch=0,
            grid=(grid_r,),
            in_specs=[
                pl.BlockSpec((tile_r, lanes), lambda i: (i, 0)),   # x tiles
                pl.BlockSpec((1, lanes), lambda i: (0, 0)),        # mu (resident)
                pl.BlockSpec((1, lanes), lambda i: (0, 0)),        # inv_std
                pl.BlockSpec((lanes, pack), lambda i: (0, 0)),     # selector
                pl.BlockSpec((1, pack), lambda i: (0, 0)),         # bias
            ],
            out_specs=pl.BlockSpec((tile_r, pack), lambda i: (i, 0)),
        ),
        compiler_params=pltpu.CompilerParams(
            dimension_semantics=("parallel",),   # v7x: shard grid across both TCs
        ),
    )(xp, mu_t, inv_t, sel, bias_row)

    return out.reshape(-1)[:n]


def _reference_log_prob(x, means, log_stds):
    # pure-JAX reference for sanity checking
    var = jnp.exp(log_stds) ** 2
    quad = jnp.sum((x - means) ** 2 / var, axis=-1)
    d = x.shape[-1]
    return -0.5 * quad - jnp.sum(log_stds) - 0.5 * d * jnp.log(2.0 * jnp.pi)


if __name__ == "__main__":
    key = jax.random.PRNGKey(0)
    k_x, k_mu, k_ls, k_x2 = jax.random.split(key, 4)

    N, D = 8, 32  # small batch of points in a D-dim MVN

    # Deterministic parameter init mirroring MVNModel.__init__ (init=(0.0, 0.0)):
    #   means    = init[0] + randn(dim)
    #   log_stds = log(Uniform(init[1], init[1] + 2))
    init_mean, init_logstd = 0.0, 0.0
    means = init_mean + jax.random.normal(k_mu, (D,), dtype=jnp.float32)
    log_stds = jnp.log(
        jax.random.uniform(k_ls, (D,), dtype=jnp.float32,
                           minval=init_logstd, maxval=init_logstd + 2.0)
    )

    x = jax.random.normal(k_x, (N, D), dtype=jnp.float32)

    out = mvn_log_prob(x, means, log_stds)
    out = jax.block_until_ready(out)
    ref = _reference_log_prob(x, means, log_stds)
    assert out.shape == (N,)
    assert jnp.allclose(out, ref, rtol=1e-4, atol=1e-3), (out, ref)

    # Secondary check: multi-tile grid + ragged tail (N not a tile multiple).
    N2 = 9000
    x2 = jax.random.normal(k_x2, (N2, D), dtype=jnp.float32)
    out2 = jax.block_until_ready(mvn_log_prob(x2, means, log_stds))
    ref2 = _reference_log_prob(x2, means, log_stds)
    assert out2.shape == (N2,)
    assert jnp.allclose(out2, ref2, rtol=1e-4, atol=1e-3)

    print("KERNEL_OK")
</pallas_src>

<mosaic_0001>
module attributes {stable_mosaic.version = 11 : i64} {
  func.func @_mvn_logprob_kernel(%arg0: i32, %arg1: memref<8x128xf32, #tpu.memory_space<vmem>>, %arg2: memref<1x128xf32, #tpu.memory_space<vmem>>, %arg3: memref<1x128xf32, #tpu.memory_space<vmem>>, %arg4: memref<128x4xf32, #tpu.memory_space<vmem>>, %arg5: memref<1x4xf32, #tpu.memory_space<vmem>>, %arg6: memref<8x4xf32, #tpu.memory_space<vmem>>) attributes {dimension_semantics = [#tpu.dimension_semantics<parallel>], iteration_bounds = array<i64: 1>, scalar_prefetch = 0 : i64, scratch_operands = 0 : i64, tpu.core_type = #tpu.core_type<tc>, window_params = [{transform_indices = @transform_0, window_bounds = array<i64: 8, 128>}, {pipeline_mode = #tpu.pipeline_mode<synchronous>, transform_indices = @transform_1, window_bounds = array<i64: 1, 128>}, {pipeline_mode = #tpu.pipeline_mode<synchronous>, transform_indices = @transform_2, window_bounds = array<i64: 1, 128>}, {pipeline_mode = #tpu.pipeline_mode<synchronous>, transform_indices = @transform_3, window_bounds = array<i64: 128, 4>}, {pipeline_mode = #tpu.pipeline_mode<synchronous>, transform_indices = @transform_4, window_bounds = array<i64: 1, 4>}, {transform_indices = @transform_5, window_bounds = array<i64: 8, 4>}]} {
    %c0 = arith.constant 0 : index
    %c0_0 = arith.constant 0 : index
    %0 = vector.load %arg1[%c0, %c0_0] : memref<8x128xf32, #tpu.memory_space<vmem>>, vector<8x128xf32>
    %c0_1 = arith.constant 0 : index
    %c0_2 = arith.constant 0 : index
    %1 = vector.load %arg2[%c0_1, %c0_2] : memref<1x128xf32, #tpu.memory_space<vmem>>, vector<1x128xf32>
    %2 = vector.broadcast %1 : vector<1x128xf32> to vector<8x128xf32>
    %3 = arith.subf %0, %2 : vector<8x128xf32>
    %c0_3 = arith.constant 0 : index
    %c0_4 = arith.constant 0 : index
    %4 = vector.load %arg3[%c0_3, %c0_4] : memref<1x128xf32, #tpu.memory_space<vmem>>, vector<1x128xf32>
    %5 = vector.broadcast %4 : vector<1x128xf32> to vector<8x128xf32>
    %6 = arith.mulf %3, %5 : vector<8x128xf32>
    %7 = arith.mulf %6, %6 : vector<8x128xf32>
    %c0_5 = arith.constant 0 : index
    %c0_6 = arith.constant 0 : index
    %8 = vector.load %arg4[%c0_5, %c0_6] : memref<128x4xf32, #tpu.memory_space<vmem>>, vector<128x4xf32>
    %cst = arith.constant dense<0.000000e+00> : vector<8x4xf32>
    %9 = tpu.matmul %7, %8, %cst {dimension_numbers = #tpu.dot_dimension_numbers<[1], [0], [0], [1], [0, 0, 1, 1], [], []>} : vector<8x128xf32>, vector<128x4xf32>, vector<8x4xf32> -> vector<8x4xf32>
    %c0_7 = arith.constant 0 : index
    %c0_8 = arith.constant 0 : index
    %10 = vector.load %arg5[%c0_7, %c0_8] : memref<1x4xf32, #tpu.memory_space<vmem>>, vector<1x4xf32>
    %11 = vector.broadcast %10 : vector<1x4xf32> to vector<8x4xf32>
    %12 = arith.addf %9, %11 : vector<8x4xf32>
    %c0_9 = arith.constant 0 : index
    %c0_10 = arith.constant 0 : index
    %13 = vector.load %arg6[%c0_9, %c0_10] : memref<8x4xf32, #tpu.memory_space<vmem>>, vector<8x4xf32>
    tpu.vector_store %arg6[%c0_9, %c0_10], %12 {strides = array<i32>} : memref<8x4xf32, #tpu.memory_space<vmem>>, vector<8x4xf32>,
    return
  }
  func.func @transform_0(%arg0: i32) -> (i32, i32) {
    %c0_i32 = arith.constant 0 : i32
    %c0_i32_0 = arith.constant 0 : i32
    return %arg0, %c0_i32 : i32, i32
  }
  func.func @transform_1(%arg0: i32) -> (i32, i32) {
    %c0_i32 = arith.constant 0 : i32
    %c0_i32_0 = arith.constant 0 : i32
    %c0_i32_1 = arith.constant 0 : i32
    return %c0_i32, %c0_i32_0 : i32, i32
  }
  func.func @transform_2(%arg0: i32) -> (i32, i32) {
    %c0_i32 = arith.constant 0 : i32
    %c0_i32_0 = arith.constant 0 : i32
    %c0_i32_1 = arith.constant 0 : i32
    return %c0_i32, %c0_i32_0 : i32, i32
  }
  func.func @transform_3(%arg0: i32) -> (i32, i32) {
    %c0_i32 = arith.constant 0 : i32
    %c0_i32_0 = arith.constant 0 : i32
    %c0_i32_1 = arith.constant 0 : i32
    return %c0_i32, %c0_i32_0 : i32, i32
  }
  func.func @transform_4(%arg0: i32) -> (i32, i32) {
    %c0_i32 = arith.constant 0 : i32
    %c0_i32_0 = arith.constant 0 : i32
    %c0_i32_1 = arith.constant 0 : i32
    return %c0_i32, %c0_i32_0 : i32, i32
  }
  func.func @transform_5(%arg0: i32) -> (i32, i32) {
    %c0_i32 = arith.constant 0 : i32
    %c0_i32_0 = arith.constant 0 : i32
    return %arg0, %c0_i32 : i32, i32
  }
}

</mosaic_0001>

<bundles_post_ra>
// kernel: tpu_custom_call.1
= control target key start
LH: loop header
LB: loop body
LE: loop exit
PB: predicated region body
PF: predicated region fallthrough
CT: control target
= control target key end

     0   :  { %v219_v0 = vmov 0.0|0.0   ;;  %vm220_vm0 = vmmov 0   ;;  %v221_v4 = vmov 0.0   ;;  %vm131_vm1 = vcmask 31744   ;;  %s315_s3 = inlined_call_operand.vmem [shape: f32[128,4], index: 3, kind: input, shape index: {}]   ;;  %s316_s0 = inlined_call_operand.vmem [shape: f32[8,128], index: 0, kind: input, shape index: {}]   ;;  %s317_s1 = inlined_call_operand.vmem [shape: f32[1,128], index: 1, kind: input, shape index: {}]   ;;  %s318_s2 = inlined_call_operand.vmem [shape: f32[1,128], index: 2, kind: input, shape index: {}]   ;;  %s319_s4 = inlined_call_operand.vmem [shape: f32[1,4], index: 4, kind: input, shape index: {}]   ;;  %s320_s5 = inlined_call_operand.vmem [shape: f32[8,4], index: 5, kind: output, shape index: {}]  }
   0x1   :  { %192 = vmatprep.subr.bf16.mxu0 %v219_v0  ;;  %v38_v1 = vld [vmem:[%s315_s3] sm:$0xff]  ;;  %v39_v2 = vld [vmem:[%s315_s3 + $0x8] sm:$0xff]  ;;  %v40_v3 = vld [vmem:[%s315_s3 + $0x10] sm:$0xff]  ;;  %189 = vmatprep.mubr.msk.f32.mxu0 %vm220_vm0, %v221_v4 }
   0x2   :  { %v193_v5 = vpack.c.bf16 %v39_v2, %v38_v1  ;;  %v41_v6 = vld [vmem:[%s315_s3 + $0x18] sm:$0xff]  ;;  %v42_v8 = vld [vmem:[%s315_s3 + $0x20] sm:$0xff]  ;;  %v43_v9 = vld [vmem:[%s315_s3 + $0x28] sm:$0xff] }
   0x3   :  { %v196_v7 = vpack.c.bf16 %v41_v6, %v40_v3  ;;  %v199_v10 = vpack.c.bf16 %v43_v9, %v42_v8  ;;  %v44_v11 = vld [vmem:[%s315_s3 + $0x30] sm:$0xff]  ;;  %v45_v12 = vld [vmem:[%s315_s3 + $0x38] sm:$0xff]  ;;  %v46_v14 = vld [vmem:[%s315_s3 + $0x40] sm:$0xff] }
   0x4   :  { %194 = vmatpush3.bf16.msra.mxu0 %v193_v5  ;;  %v202_v13 = vpack.c.bf16 %v45_v12, %v44_v11  ;;  %v47_v15 = vld [vmem:[%s315_s3 + $0x48] sm:$0xff]  ;;  %v48_v17 = vld [vmem:[%s315_s3 + $0x50] sm:$0xff]  ;;  %v49_v18 = vld [vmem:[%s315_s3 + $0x58] sm:$0xff] }
   0x5   :  { %195 = vmatprep.subr.bf16.mxu0 %v219_v0  ;;  %v205_v16 = vpack.c.bf16 %v47_v15, %v46_v14  ;;  %v208_v19 = vpack.c.bf16 %v49_v18, %v48_v17  ;;  %v20_v20 = vld [vmem:[%s316_s0] sm:$0xff]  ;;  %v51_v23 = vld [vmem:[%s315_s3 + $0x68] sm:$0xff]  ;;  %v52_v27 = vld [vmem:[%s315_s3 + $0x70] sm:$0xff] }
   0x6   :  { %v137_v21 = vld [vmem:[%s317_s1] ss:$0 sm:$0xff]  ;;  %v53_v28 = vld [vmem:[%s315_s3 + $0x78] sm:$0xff] }
   0x7   :  { %v50_v22 = vld [vmem:[%s315_s3 + $0x60] sm:$0xff]  ;;  %v28_v24 = vsub.f32 %v20_v20, %v137_v21  ;;  %v214_v30 = vpack.c.bf16 %v53_v28, %v52_v27 }
   0x8   :  { %197 = vmatpush3.bf16.msra.mxu0 %v196_v7  ;;  %v211_v25 = vpack.c.bf16 %v51_v23, %v50_v22  ;;  %v138_v26 = vld [vmem:[%s318_s2] ss:$0 sm:$0xff] }
   0x9   :  { %198 = vmatprep.subr.bf16.mxu0 %v219_v0  ;;  %v36_v29 = vmul.f32 %v138_v26, %v28_v24  ;;  %v139_v32 = vld [vmem:[%s319_s4] ss:$0 sm:$0xff] }
   0xb   :  { %v37_v31 = vmul.f32 %v36_v29, %v36_v29 }
   0xc   :  { %200 = vmatpush3.bf16.msra.mxu0 %v199_v10 }
   0xd   :  { %201 = vmatprep.subr.bf16.mxu0 %v219_v0 }
  0x10   :  { %203 = vmatpush3.bf16.msra.mxu0 %v202_v13 }
  0x11   :  { %204 = vmatprep.subr.bf16.mxu0 %v219_v0 }
  0x14   :  { %206 = vmatpush3.bf16.msra.mxu0 %v205_v16 }
  0x15   :  { %207 = vmatprep.subr.bf16.mxu0 %v219_v0 }
  0x18   :  { %209 = vmatpush3.bf16.msra.mxu0 %v208_v19 }
  0x19   :  { %210 = vmatprep.subr.bf16.mxu0 %v219_v0 }
  0x1c   :  { %212 = vmatpush3.bf16.msra.mxu0 %v211_v25 }
  0x1d   :  { %213 = vmatprep.subr.bf16.mxu0 %v219_v0 }
  0x20   :  { %215 = vmatpush3.bf16.msra.mxu0 %v214_v30 }
  0x23   :  { %190 = vmatmul.mubr.f32.vlgmr.msra.gmra.mrb[0].mxu0 %v37_v31 }
  0xf6   :  { %v127_v33 = vpop.f32.mrb[0].mxu0 }
  0xf7   :  { %v128_v34 = vadd.f32 %v139_v32, %v127_v33  ;;  %v191_v35 = vpop.f32.mrb[1].mxu0 }
  0xf9   :  { %132 = vst.msk [vmem:[%s320_s5] sm:$0xff] %vm131_vm1, %v128_v34 }

</bundles_post_ra>
